<compile_context>
chip_gen: v7x
topology: tpu7x:2x2x1
jax: 0.10.0
libtpu: 0.0.40
codegen_flags: <defaults>
</compile_context>

<pallas_src>
import functools

import jax
import jax.numpy as jnp
from jax import lax
from jax.experimental import pallas as pl
from jax.experimental.pallas import tpu as pltpu


def _partial_sum_128(x):
    """VPU-only partial reduce of (rows, tile_k) -> (rows, 128) lane groups."""
    c = x.shape[1]
    acc = x[:, 0:128]
    for g in range(1, c // 128):
        acc = acc + x[:, g * 128:(g + 1) * 128]
    return acc


def _mean_rows_single_kernel(x_ref, o_ref, *, inv_count):
    """Single-chunk case (tile_k == H*W): no scratch, no accumulator."""
    x = x_ref[...].astype(jnp.float32)
    s = jnp.sum(x, axis=-1, keepdims=True)
    o_ref[...] = (s * jnp.float32(inv_count)).astype(o_ref.dtype)


def _mean_rows_multi_kernel(x_ref, o_ref, acc_ref, *, inv_count, true_k,
                            tile_k, mask_last):
    """Multi-chunk case: small (tile_r, 128) f32 accumulator across k chunks."""
    k = pl.program_id(1)
    n_k = pl.num_programs(1)

    x = x_ref[...].astype(jnp.float32)

    if mask_last:
        # Interior chunks: unmasked accumulate (write-only init at k == 0).
        @pl.when(k < n_k - 1)
        def _():
            p = _partial_sum_128(x)

            @pl.when(k == 0)
            def _():
                acc_ref[...] = p

            @pl.when(k > 0)
            def _():
                acc_ref[...] += p

        # Last (partial) chunk only: mask lanes past H*W.  (n_k >= 2 here, so
        # k == last implies k > 0 and the accumulator is already initialized.)
        @pl.when(k == n_k - 1)
        def _():
            col = k * tile_k + lax.broadcasted_iota(jnp.int32, x.shape, 1)
            xm = jnp.where(col < true_k, x, 0.0)
            acc_ref[...] += _partial_sum_128(xm)
    else:
        p = _partial_sum_128(x)

        @pl.when(k == 0)
        def _():
            acc_ref[...] = p

        @pl.when(k > 0)
        def _():
            acc_ref[...] += p

    # Single cross-lane (XLU) reduce + scale once per output tile.
    @pl.when(k == n_k - 1)
    def _():
        s = jnp.sum(acc_ref[...], axis=-1, keepdims=True)
        o_ref[...] = (s * jnp.float32(inv_count)).astype(o_ref.dtype)


def _choose_tiles(n_rows, n_cols, itemsize):
    """Pick (tile_r, tile_k, vmem_limit): lane/sublane friendly, VMEM-safe."""
    # Sub-32-bit dtypes pack along sublanes -> bigger row granule.
    row_granule = {4: 8, 2: 16, 1: 32}.get(itemsize, 8)

    # Generation-aware VMEM budget: v7x has 64 MiB / TC, v5e/v6e 128 MiB.
    try:
        vmem_cap = int(pltpu.get_tpu_info().vmem_capacity_bytes)
    except Exception:
        vmem_cap = 64 * 1024 * 1024
    if vmem_cap <= 64 * 1024 * 1024:
        budget_bytes = 6 * 1024 * 1024   # per (double-buffered) input tile
        vmem_limit = 48 * 1024 * 1024
    else:
        budget_bytes = 8 * 1024 * 1024
        vmem_limit = 64 * 1024 * 1024

    # Reduction axis: keep H*W in a single chunk whenever at least one sublane
    # granule of rows fits the budget (covers essentially all conv shapes).
    if n_cols * itemsize * row_granule <= budget_bytes:
        tile_k = n_cols
    else:
        # Chunk K.  Prefer a 128-multiple divisor of K (no edge mask at all);
        # otherwise fall back to a 4096 chunk with a masked last block.
        max_chunk = 4096
        tile_k = max_chunk
        for cand in range(max_chunk, 1024 - 1, -128):
            if n_cols % cand == 0:
                tile_k = cand
                break

    # Dtype-aware row tile: fill the input-tile budget (input buffer bytes are
    # tile_r * tile_k * itemsize; the f32 accumulator is only tile_r * 512 B).
    tile_r = budget_bytes // (tile_k * itemsize)
    tile_r = max(row_granule, (tile_r // row_granule) * row_granule)
    tile_r = min(tile_r, 4096)
    if tile_r >= n_rows:
        tile_r = n_rows  # full-extent row block is always a legal block dim
        # v7x megacore: expose >= 2 parallel row tiles when possible.
        if n_rows > row_granule:
            half = -(-n_rows // 2)                       # ceil(n_rows / 2)
            half = -(-half // row_granule) * row_granule  # round up to granule
            if half < n_rows:
                tile_r = half
    return tile_r, tile_k, vmem_limit


def mean_hw(x, *, _force_tiles=None):
    """Pallas TPU implementation of x.mean((2, 3)) for NCHW input."""
    N, C, H, W = x.shape
    R, K = N * C, H * W

    x2 = x.reshape(R, K)  # H, W contiguous -> free reshape
    itemsize = jnp.dtype(x.dtype).itemsize
    if _force_tiles is None:
        tile_r, tile_k, vmem_limit = _choose_tiles(R, K, itemsize)
    else:
        tile_r, tile_k = _force_tiles
        vmem_limit = 48 * 1024 * 1024

    grid_r = pl.cdiv(R, tile_r)
    grid_k = pl.cdiv(K, tile_k)
    inv_count = 1.0 / float(K)

    if grid_k == 1:
        # Common conv case: whole H*W in one chunk -> no scratch, no acc.
        kernel = functools.partial(_mean_rows_single_kernel,
                                   inv_count=inv_count)
        out = pl.pallas_call(
            kernel,
            out_shape=jax.ShapeDtypeStruct((R, 1), x.dtype),
            grid_spec=pltpu.PrefetchScalarGridSpec(
                num_scalar_prefetch=0,
                grid=(grid_r,),
                in_specs=[pl.BlockSpec((tile_r, tile_k), lambda r: (r, 0))],
                out_specs=pl.BlockSpec((tile_r, 1), lambda r: (r, 0)),
            ),
            compiler_params=pltpu.CompilerParams(
                dimension_semantics=("parallel",),
                vmem_limit_bytes=vmem_limit,
            ),
        )(x2)
    else:
        mask_last = (K % tile_k) != 0
        kernel = functools.partial(
            _mean_rows_multi_kernel,
            inv_count=inv_count,
            true_k=K,
            tile_k=tile_k,
            mask_last=mask_last,
        )
        out = pl.pallas_call(
            kernel,
            out_shape=jax.ShapeDtypeStruct((R, 1), x.dtype),
            grid_spec=pltpu.PrefetchScalarGridSpec(
                num_scalar_prefetch=0,
                grid=(grid_r, grid_k),
                in_specs=[pl.BlockSpec((tile_r, tile_k), lambda r, k: (r, k))],
                out_specs=pl.BlockSpec((tile_r, 1), lambda r, k: (r, 0)),
                scratch_shapes=[pltpu.VMEM((tile_r, 128), jnp.float32)],
            ),
            compiler_params=pltpu.CompilerParams(
                # Row tiles are independent (shardable across v7x's 2 TCs);
                # the H*W reduction axis must stay sequential.
                dimension_semantics=("parallel", "arbitrary"),
                vmem_limit_bytes=vmem_limit,
            ),
        )(x2)

    return out[:, 0].reshape(N, C)


if __name__ == "__main__":
    key = jax.random.PRNGKey(0)

    # 1) Small NCHW conv-style input (single-chunk fast path).
    N, C, H, W = 2, 4, 16, 16
    x = jax.random.normal(key, (N, C, H, W), dtype=jnp.float32)
    out = jax.block_until_ready(mean_hw(x))
    ref = jnp.mean(x, axis=(2, 3))
    assert out.shape == (N, C), out.shape
    assert jnp.allclose(out, ref, atol=1e-5, rtol=1e-5), "mismatch (single)"

    # 2) Non-divisible-K, multi-chunk path (forced small tiles to exercise the
    #    masked last chunk + (tile_r, 128) accumulator on a small input).
    N2, C2, H2, W2 = 2, 4, 20, 15  # K = 300, not a multiple of tile_k = 128
    x2 = jax.random.normal(jax.random.PRNGKey(0), (N2, C2, H2, W2),
                           dtype=jnp.float32)
    out2 = jax.block_until_ready(mean_hw(x2, _force_tiles=(8, 128)))
    ref2 = jnp.mean(x2, axis=(2, 3))
    assert out2.shape == (N2, C2), out2.shape
    assert jnp.allclose(out2, ref2, atol=1e-5, rtol=1e-5), "mismatch (multi)"

    print("KERNEL_OK")
</pallas_src>

<mosaic_0001>
module attributes {stable_mosaic.version = 11 : i64} {
  func.func @_mean_rows_single_kernel(%arg0: i32, %arg1: memref<8x256xf32, #tpu.memory_space<vmem>>, %arg2: memref<8x1xf32, #tpu.memory_space<vmem>>) attributes {dimension_semantics = [#tpu.dimension_semantics<parallel>], iteration_bounds = array<i64: 1>, scalar_prefetch = 0 : i64, scratch_operands = 0 : i64, tpu.core_type = #tpu.core_type<tc>, window_params = [{transform_indices = @transform_0, window_bounds = array<i64: 8, 256>}, {transform_indices = @transform_1, window_bounds = array<i64: 8, 1>}]} {
    %c0 = arith.constant 0 : index
    %c0_0 = arith.constant 0 : index
    %0 = vector.load %arg1[%c0, %c0_0] : memref<8x256xf32, #tpu.memory_space<vmem>>, vector<8x256xf32>
    %cst = arith.constant dense<0.000000e+00> : vector<8xf32>
    %1 = vector.multi_reduction <add>, %0, %cst [1] : vector<8x256xf32> to vector<8xf32>
    %2 = vector.shape_cast %1 : vector<8xf32> to vector<8x1xf32>
    %cst_1 = arith.constant 3.906250e-03 : f32
    %3 = vector.broadcast %cst_1 : f32 to vector<8x1xf32>
    %4 = arith.mulf %2, %3 : vector<8x1xf32>
    %c0_2 = arith.constant 0 : index
    %c0_3 = arith.constant 0 : index
    %5 = vector.load %arg2[%c0_2, %c0_3] : memref<8x1xf32, #tpu.memory_space<vmem>>, vector<8x1xf32>
    tpu.vector_store %arg2[%c0_2, %c0_3], %4 {strides = array<i32>} : memref<8x1xf32, #tpu.memory_space<vmem>>, vector<8x1xf32>,
    return
  }
  func.func @transform_0(%arg0: i32) -> (i32, i32) {
    %c0_i32 = arith.constant 0 : i32
    %c0_i32_0 = arith.constant 0 : i32
    return %arg0, %c0_i32 : i32, i32
  }
  func.func @transform_1(%arg0: i32) -> (i32, i32) {
    %c0_i32 = arith.constant 0 : i32
    %c0_i32_0 = arith.constant 0 : i32
    return %arg0, %c0_i32 : i32, i32
  }
}

</mosaic_0001>

<bundles_post_ra>
// kernel: tpu_custom_call.1
= control target key start
LH: loop header
LB: loop body
LE: loop exit
PB: predicated region body
PF: predicated region fallthrough
CT: control target
= control target key end

     0   :  { %6 = vsyncpa [#allocation3], 0  ;;  %s58_s6 = smov [#allocation2]   ;;  %s84_s0 = inlined_call_operand.hbm [shape: f32[8,256], index: 0, kind: input, shape index: {}]   ;;  %s85_s1 = inlined_call_operand.vmem [shape: f32[8,1], index: 1, kind: output, shape index: {}]  }
   0x1   :  { %s13_s7 = sshll.u32 %s58_s6, 4  ;;  %s34_s10 = scalar_lea.hbm %s84_s0, 256  ;;  %s14_s7 = int_to_ptr.vmem [resolvable:$true] %s13_s7 }
   0x2   :  { %p35_p0 = scmp.ne.s32.totalorder %s84_s0, %s34_s10  ;;  %p38_p1 = scmp.lt.u32.totalorder %s34_s10, %s84_s0 }
   0x4   :  { %p40_p2 = pnand %p38_p1, %p35_p0 }
   0x6   :  { %43 = shalt.err (!%p40_p2)
}
   0x7   :  { %s44_s15 = scalar_lea.vmem %s14_s7, 256  ;;  %p49_p4 = scmp.lt.s32.totalorder %s14_s7, %s14_s7 }
   0x8   :  { %p45_p3 = scmp.ne.s32.totalorder %s14_s7, %s44_s15  ;;  %p50_p5 = scmp.lt.s32.totalorder %s44_s15, %s44_s15 }
   0xa   :  { %p51_p6 = por %p50_p5, %p49_p4 }
   0xc   :  { %p52_p7 = pnand %p51_p6, %p45_p3 }
   0xe   :  { %55 = shalt.err (!%p52_p7)
}
   0xf   :  { %16 = dma.hbm_to_vmem [thread:$0]  %s84_s0, 256, %s14_s7, [#allocation3]  }
  0x10   :  { %56 = dma.done.wait [#allocation3], 256  }
  0x11   :  { %57 = vsyncadd [#allocation3], 4294967040  ;;  %v20_v0 = vld [vmem:[#allocation2] sm:$0xff]  ;;  %v21_v1 = vld [vmem:[#allocation2 + $0x8] sm:$0xff]  ;;  %vm26_vm0 = vcmask 7168  }
  0x12   :  { %v22_v2 = vadd.f32 %v21_v1, %v20_v0 }
  0x14   :  { %23 = vadd.xlane.f32.xlu0 %v22_v2 }
  0xa1   :  { %v24_v3 = vpop.xlane.xlu0 %23 }
  0xa2   :  { %v25_v4 = vmul.f32 0.00390625, %v24_v3 }
  0xa4   :  { %27 = vst.msk [vmem:[%s85_s1] sm:$0xff] %vm26_vm0, %v25_v4 }
  0xa5   :  { %32 = vsyncpa [#allocation3], 1 }

</bundles_post_ra>
